<compile_context>
chip_gen: v6e
topology: v6e:2x2x1
jax: 0.10.0
libtpu: 0.0.40
codegen_flags: <defaults>
</compile_context>

<pallas_src>
import functools
import math

import jax
import jax.numpy as jnp
from jax.experimental import pallas as pl
from jax.experimental.pallas import tpu as pltpu


# ------------------------------ Pallas kernels ------------------------------

def _mesh_conv_kernel(x_ref, nbr_ref, w_ref, b_ref, o_ref, *stats_refs,
                      fuse_norm, fuse_act, emit_stats):
    # x_ref:   (C, tE)      tap 0 (the edge's own features)
    # nbr_ref: (4, C, tE)   gathered 1-ring neighbor features (taps 1..4)
    # w_ref:   (O, 7*C)     stacked conv weight (tap-major along K)
    # b_ref:   (O, 1)
    # o_ref:   (O, tE)
    # stats_refs: ((O, 2),) when emit_stats -- running [sum, sumsq] per (b, o)
    f0 = x_ref[...]
    f1 = nbr_ref[0]
    f2 = nbr_ref[1]
    f3 = nbr_ref[2]
    f4 = nbr_ref[3]

    # symmetric (order-invariant) functions of the 1-ring -- the "fake image"
    x1 = f1 + f3
    x2 = f2 + f4
    x3 = jnp.abs(f1 - f3)
    x4 = jnp.abs(f2 - f4)
    x5 = x1 + x2
    avg = x5 * 0.25
    d1 = f1 - avg
    d2 = f2 - avg
    d3 = f3 - avg
    d4 = f4 - avg
    x6 = d1 * d1 + d2 * d2 + d3 * d3 + d4 * d4

    # Stack taps along the channel (sublane) axis -> single MXU matmul, K=7C.
    g = jnp.concatenate([f0, x1, x2, x3, x4, x5, x6], axis=0)      # (7C, tE)
    out = jnp.dot(w_ref[...], g, preferred_element_type=jnp.float32) + b_ref[...]

    if fuse_norm:
        # InstanceNorm2d(affine=False, eps=1e-5) over the full edge axis
        # (single E tile), one-pass sum / sumsq, variance clamped at 0.
        inv_n = 1.0 / out.shape[1]
        s = jnp.sum(out, axis=1, keepdims=True)
        ss = jnp.sum(out * out, axis=1, keepdims=True)
        mean = s * inv_n
        var = jnp.maximum(ss * inv_n - mean * mean, 0.0)
        out = (out - mean) * jax.lax.rsqrt(var + 1e-5)
    if fuse_act:
        out = jnp.where(out > 0, out, 0.01 * out)     # F.leaky_relu default

    o_ref[...] = out.astype(o_ref.dtype)

    if emit_stats:
        stats_ref = stats_refs[0]                     # (O, 2), revisited over E

        @pl.when(pl.program_id(1) == 0)
        def _():
            stats_ref[...] = jnp.zeros_like(stats_ref)

        s = jnp.sum(out, axis=1, keepdims=True)
        ss = jnp.sum(out * out, axis=1, keepdims=True)
        stats_ref[...] = stats_ref[...] + jnp.concatenate([s, ss], axis=1)


def _norm_act_kernel(y_ref, mean_ref, inv_ref, o_ref, *, apply_act):
    out = (y_ref[...] - mean_ref[...]) * inv_ref[...]
    if apply_act:
        out = jnp.where(out > 0, out, 0.01 * out)
    o_ref[...] = out.astype(o_ref.dtype)


# ------------------------------- host wrappers -------------------------------

_VMEM_LIMIT = 32 * 1024 * 1024


def _pick_tile(E, target):
    """Largest multiple of 128 that divides E and is <= target (else full E)."""
    if E % 128 != 0:
        return E
    t = max(128, (min(E, target) // 128) * 128)
    while E % t != 0:
        t -= 128
    return t


def mesh_conv2(x, gemm_idx, w_stacked, b_col, *, apply_norm=False,
               apply_act=False, tile_target=1024):
    """MeshConv2.forward: neighbor gather, symmetric taps, Conv2d(1,7) [+IN+act].

    x:         (B, C, E) float32 edge features
    gemm_idx:  (B, E, 5) int32; col 0 = edge id, cols 1..4 = 1-ring neighbors
               (missing neighbors are -1, matching create_GeMM's Gi+1/zero-pad)
    w_stacked: (O, 7*C) conv weight, row o = [w[o,:,tap0], ..., w[o,:,tap6]]
    b_col:     (O, 1) bias
    returns    (B, O, E) float32  (== PyTorch (B, O, E, 1) squeezed)
    """
    B, C, E = x.shape
    O = w_stacked.shape[0]
    assert w_stacked.shape[1] == 7 * C

    # --- glue (plain JAX): gather the 4 real neighbors, E stays the minor dim.
    x_pad = jnp.concatenate([jnp.zeros((B, C, 1), x.dtype), x], axis=2)   # (B,C,E+1)
    idx_n = jnp.transpose(gemm_idx[:, :, 1:5].astype(jnp.int32) + 1,
                          (0, 2, 1))                                      # (B,4,E)
    gather_tap = lambda xp, ii: xp[:, ii]                                 # (C,E+1),(E)->(C,E)
    nbr = jax.vmap(jax.vmap(gather_tap, in_axes=(None, 0)),
                   in_axes=(0, 0))(x_pad, idx_n)                          # (B,4,C,E)

    tE = _pick_tile(E, tile_target)
    nE = E // tE
    fuse_norm = apply_norm and nE == 1
    emit_stats = apply_norm and nE > 1
    fuse_act = apply_act and not emit_stats

    grid = (B, nE)
    in_specs = [
        pl.BlockSpec((None, C, tE), lambda b, e: (b, 0, e)),
        pl.BlockSpec((None, 4, C, tE), lambda b, e: (b, 0, 0, e)),
        pl.BlockSpec((O, 7 * C), lambda b, e: (0, 0)),
        pl.BlockSpec((O, 1), lambda b, e: (0, 0)),
    ]
    out_conv_spec = pl.BlockSpec((None, O, tE), lambda b, e: (b, 0, e))
    out_conv_shape = jax.ShapeDtypeStruct((B, O, E), jnp.float32)

    kernel = functools.partial(_mesh_conv_kernel, fuse_norm=fuse_norm,
                               fuse_act=fuse_act, emit_stats=emit_stats)
    cp = pltpu.CompilerParams(
        dimension_semantics=("parallel", "arbitrary" if emit_stats else "parallel"),
        vmem_limit_bytes=_VMEM_LIMIT)

    if not emit_stats:
        return pl.pallas_call(
            kernel, out_shape=out_conv_shape, grid=grid,
            in_specs=in_specs, out_specs=out_conv_spec,
            compiler_params=cp)(x, nbr, w_stacked, b_col)

    # E is tiled and InstanceNorm needs full-E statistics: accumulate sum/sumsq
    # in a revisited (B,O,2) output, then normalize + activate in a second
    # (cheap, fully parallel) elementwise kernel.
    out_shape = (out_conv_shape, jax.ShapeDtypeStruct((B, O, 2), jnp.float32))
    out_specs = (out_conv_spec,
                 pl.BlockSpec((None, O, 2), lambda b, e: (b, 0, 0)))
    y, stats = pl.pallas_call(
        kernel, out_shape=out_shape, grid=grid,
        in_specs=in_specs, out_specs=out_specs,
        compiler_params=cp)(x, nbr, w_stacked, b_col)

    mean = stats[..., 0:1] / E                                       # (B,O,1)
    var = jnp.maximum(stats[..., 1:2] / E - mean * mean, 0.0)
    inv = jax.lax.rsqrt(var + 1e-5)

    return pl.pallas_call(
        functools.partial(_norm_act_kernel, apply_act=apply_act),
        out_shape=jax.ShapeDtypeStruct((B, O, E), jnp.float32),
        grid=(B, nE),
        in_specs=[pl.BlockSpec((None, O, tE), lambda b, e: (b, 0, e)),
                  pl.BlockSpec((None, O, 1), lambda b, e: (b, 0, 0)),
                  pl.BlockSpec((None, O, 1), lambda b, e: (b, 0, 0))],
        out_specs=pl.BlockSpec((None, O, tE), lambda b, e: (b, 0, e)),
        compiler_params=pltpu.CompilerParams(
            dimension_semantics=("parallel", "parallel"),
            vmem_limit_bytes=_VMEM_LIMIT),
    )(y, mean, inv)


# ------------------------- parameter initialization -------------------------

def _xavier_normal_stacked(key, out_c, in_c, k=7):
    """Xavier-normal Conv2d(kernel=(1,k)) weight, stored as (O, k*C) tap-major."""
    fan_in = in_c * k
    fan_out = out_c * k
    std = math.sqrt(2.0 / (fan_in + fan_out))
    w_ocj = std * jax.random.normal(key, (out_c, in_c, k), dtype=jnp.float32)
    # stacked row o = [w[o,:,0], w[o,:,1], ..., w[o,:,k-1]]
    return jnp.transpose(w_ocj, (0, 2, 1)).reshape(out_c, k * in_c)


def init_mesh_decoder_params(key, convs, *, transfer_data=True, k=7):
    params = {"up_convs": [], "final": None}
    n_up = len(convs) - 2
    keys = jax.random.split(key, 2 * n_up + 2)
    for i in range(n_up):
        in_c, out_c = convs[i], convs[i + 1]
        c1_in = 2 * out_c if transfer_data else out_c
        params["up_convs"].append({
            "up_w": _xavier_normal_stacked(keys[2 * i], out_c, in_c, k),
            "up_b": jnp.zeros((out_c, 1), jnp.float32),
            "c1_w": _xavier_normal_stacked(keys[2 * i + 1], out_c, c1_in, k),
            "c1_b": jnp.zeros((out_c, 1), jnp.float32),
        })
    in_c, out_c = convs[-2], convs[-1]
    params["final"] = {
        "up_w": _xavier_normal_stacked(keys[-2], out_c, in_c, k),
        "up_b": jnp.zeros((out_c, 1), jnp.float32),
        "c1_w": _xavier_normal_stacked(keys[-1], out_c, out_c, k),
        "c1_b": jnp.zeros((out_c, 1), jnp.float32),
    }
    return params


# ----------------------------- forward functions -----------------------------

def up_conv_forward(p, fe, gemm_idx, from_down, *, transfer_data, batch_norm,
                    tile_target=1024):
    # blocks=0 path.
    # TODO(synk): MeshUnpool (unroll > 0) has no definition in the reference; only unroll=0 supported.
    x1 = mesh_conv2(fe, gemm_idx, p["up_w"], p["up_b"],
                    tile_target=tile_target)                     # up_conv, no norm/act
    if transfer_data:
        # (possible further opt: split c1_w and skip this concat; kept for clarity)
        x1 = jnp.concatenate([x1, from_down], axis=1)            # skip connection
    x1 = mesh_conv2(x1, gemm_idx, p["c1_w"], p["c1_b"],
                    apply_norm=batch_norm, apply_act=True,
                    tile_target=tile_target)                     # conv1 + IN + leaky_relu
    return x1


def mesh_decoder_forward(params, fe, gemm_idx, encoder_outs=None, *,
                         transfer_data=True, batch_norm=True, tile_target=1024):
    for i, p in enumerate(params["up_convs"]):
        before_pool = None
        if encoder_outs is not None:
            before_pool = encoder_outs[-(i + 2)]
        fe = up_conv_forward(p, fe, gemm_idx, before_pool,
                             transfer_data=transfer_data, batch_norm=batch_norm,
                             tile_target=tile_target)
    fe = up_conv_forward(params["final"], fe, gemm_idx, None,
                         transfer_data=False, batch_norm=batch_norm,
                         tile_target=tile_target)
    return fe


# --------------------------- pure-JAX reference ------------------------------

def _mesh_conv2_ref(x, gemm_idx, w_stacked, b_col, *, apply_norm=False,
                    apply_act=False):
    B, C, E = x.shape
    x_pad = jnp.concatenate([jnp.zeros((B, C, 1), x.dtype), x], axis=2)
    idx = gemm_idx.astype(jnp.int32) + 1
    f = jax.vmap(lambda xp, ii: xp[:, ii])(x_pad, idx)     # (B, C, E, 5)
    f = jnp.transpose(f, (0, 3, 1, 2))                     # (B, 5, C, E)
    f0, f1, f2, f3, f4 = (f[:, i] for i in range(5))
    x1 = f1 + f3
    x2 = f2 + f4
    x3 = jnp.abs(f1 - f3)
    x4 = jnp.abs(f2 - f4)
    x5 = f1 + f2 + f3 + f4
    avg = x5 / 4
    x6 = (f1 - avg) ** 2 + (f2 - avg) ** 2 + (f3 - avg) ** 2 + (f4 - avg) ** 2
    g = jnp.concatenate([f0, x1, x2, x3, x4, x5, x6], axis=1)    # (B, 7C, E)
    out = jnp.einsum('ok,bke->boe', w_stacked, g) + b_col[None]
    if apply_norm:
        mean = out.mean(axis=2, keepdims=True)
        var = ((out - mean) ** 2).mean(axis=2, keepdims=True)
        out = (out - mean) * jax.lax.rsqrt(var + 1e-5)
    if apply_act:
        out = jnp.where(out > 0, out, 0.01 * out)
    return out


def _mesh_decoder_ref(params, fe, gemm_idx, encoder_outs, *, transfer_data,
                      batch_norm):
    def up(p, fe, from_down, transfer):
        x1 = _mesh_conv2_ref(fe, gemm_idx, p["up_w"], p["up_b"])
        if transfer:
            x1 = jnp.concatenate([x1, from_down], axis=1)
        return _mesh_conv2_ref(x1, gemm_idx, p["c1_w"], p["c1_b"],
                               apply_norm=batch_norm, apply_act=True)

    for i, p in enumerate(params["up_convs"]):
        before_pool = None
        if encoder_outs is not None:
            before_pool = encoder_outs[-(i + 2)]
        fe = up(p, fe, before_pool, transfer_data)
    return up(params["final"], fe, None, False)


# ----------------------------------- main -----------------------------------

if __name__ == "__main__":
    key = jax.random.PRNGKey(0)
    k_fe, k_enc, k_gemm, k_par = jax.random.split(key, 4)

    B, E = 2, 256                    # batch, edges per mesh
    convs = [8, 16, 4]               # MeshDecoder(unrolls=[], convs=[8, 16, 4])

    fe = jax.random.normal(k_fe, (B, convs[0], E), jnp.float32)
    enc_skip = jax.random.normal(k_enc, (B, convs[1], E), jnp.float32)
    encoder_outs = [enc_skip, None]  # only encoder_outs[-(i+2)] == [-2] is consumed

    # synthetic meshes: random 1-ring neighbors; -1 marks a missing neighbor
    # (the +1 / zero-pad matches create_GeMM's handling).
    gemm_edges = jax.random.randint(k_gemm, (B, E, 4), -1, E, dtype=jnp.int32)
    edge_ids = jnp.broadcast_to(jnp.arange(E, dtype=jnp.int32)[None, :, None],
                                (B, E, 1))
    gemm_idx = jnp.concatenate([edge_ids, gemm_edges], axis=2)   # (B, E, 5)

    params = init_mesh_decoder_params(k_par, convs, transfer_data=True)

    ref = _mesh_decoder_ref(params, fe, gemm_idx, encoder_outs,
                            transfer_data=True, batch_norm=True)

    # path 1: E fits in one tile -> InstanceNorm fused inside the conv kernel
    out_fused = mesh_decoder_forward(params, fe, gemm_idx, encoder_outs,
                                     transfer_data=True, batch_norm=True,
                                     tile_target=1024)
    out_fused = jax.block_until_ready(out_fused)

    # path 2: E tiled (2 tiles) -> one-pass stats + separate normalize kernel
    out_tiled = mesh_decoder_forward(params, fe, gemm_idx, encoder_outs,
                                     transfer_data=True, batch_norm=True,
                                     tile_target=128)
    out_tiled = jax.block_until_ready(out_tiled)

    assert out_fused.shape == (B, convs[-1], E)
    assert out_tiled.shape == (B, convs[-1], E)
    for o in (out_fused, out_tiled):
        assert bool(jnp.all(jnp.isfinite(o)))
        assert float(jnp.max(jnp.abs(o - ref))) < 1e-1
    print("KERNEL_OK")
</pallas_src>

<mosaic_0001>
module attributes {stable_mosaic.version = 11 : i64} {
  func.func @_mesh_conv_kernel(%arg0: i32, %arg1: i32, %arg2: memref<1x8x256xf32, #tpu.memory_space<vmem>>, %arg3: memref<1x4x8x256xf32, #tpu.memory_space<vmem>>, %arg4: memref<16x56xf32, #tpu.memory_space<vmem>>, %arg5: memref<16x1xf32, #tpu.memory_space<vmem>>, %arg6: memref<1x16x256xf32, #tpu.memory_space<vmem>>) attributes {dimension_semantics = [#tpu.dimension_semantics<parallel>, #tpu.dimension_semantics<parallel>], iteration_bounds = array<i64: 2, 1>, scalar_prefetch = 0 : i64, scratch_operands = 0 : i64, tpu.core_type = #tpu.core_type<tc>, window_params = [{transform_indices = @transform_0, window_bounds = array<i64: 1, 8, 256>}, {transform_indices = @transform_1, window_bounds = array<i64: 1, 4, 8, 256>}, {pipeline_mode = #tpu.pipeline_mode<synchronous>, transform_indices = @transform_2, window_bounds = array<i64: 16, 56>}, {pipeline_mode = #tpu.pipeline_mode<synchronous>, transform_indices = @transform_3, window_bounds = array<i64: 16, 1>}, {transform_indices = @transform_4, window_bounds = array<i64: 1, 16, 256>}]} {
    %c0 = arith.constant 0 : index
    %c0_0 = arith.constant 0 : index
    %c0_1 = arith.constant 0 : index
    %0 = vector.load %arg2[%c0, %c0_0, %c0_1] : memref<1x8x256xf32, #tpu.memory_space<vmem>>, vector<1x8x256xf32>
    %1 = vector.shape_cast %0 : vector<1x8x256xf32> to vector<8x256xf32>
    %c0_2 = arith.constant 0 : index
    %c0_3 = arith.constant 0 : index
    %c0_4 = arith.constant 0 : index
    %c0_5 = arith.constant 0 : index
    %2 = vector.load %arg3[%c0_2, %c0_3, %c0_4, %c0_5] : memref<1x4x8x256xf32, #tpu.memory_space<vmem>>, vector<1x1x8x256xf32>
    %3 = vector.shape_cast %2 : vector<1x1x8x256xf32> to vector<8x256xf32>
    %c0_6 = arith.constant 0 : index
    %c1 = arith.constant 1 : index
    %c0_7 = arith.constant 0 : index
    %c0_8 = arith.constant 0 : index
    %4 = vector.load %arg3[%c0_6, %c1, %c0_7, %c0_8] : memref<1x4x8x256xf32, #tpu.memory_space<vmem>>, vector<1x1x8x256xf32>
    %5 = vector.shape_cast %4 : vector<1x1x8x256xf32> to vector<8x256xf32>
    %c0_9 = arith.constant 0 : index
    %c2 = arith.constant 2 : index
    %c0_10 = arith.constant 0 : index
    %c0_11 = arith.constant 0 : index
    %6 = vector.load %arg3[%c0_9, %c2, %c0_10, %c0_11] : memref<1x4x8x256xf32, #tpu.memory_space<vmem>>, vector<1x1x8x256xf32>
    %7 = vector.shape_cast %6 : vector<1x1x8x256xf32> to vector<8x256xf32>
    %c0_12 = arith.constant 0 : index
    %c3 = arith.constant 3 : index
    %c0_13 = arith.constant 0 : index
    %c0_14 = arith.constant 0 : index
    %8 = vector.load %arg3[%c0_12, %c3, %c0_13, %c0_14] : memref<1x4x8x256xf32, #tpu.memory_space<vmem>>, vector<1x1x8x256xf32>
    %9 = vector.shape_cast %8 : vector<1x1x8x256xf32> to vector<8x256xf32>
    %10 = arith.addf %3, %7 : vector<8x256xf32>
    %11 = arith.addf %5, %9 : vector<8x256xf32>
    %12 = arith.subf %3, %7 : vector<8x256xf32>
    %13 = math.absf %12 : vector<8x256xf32>
    %14 = arith.subf %5, %9 : vector<8x256xf32>
    %15 = math.absf %14 : vector<8x256xf32>
    %16 = arith.addf %10, %11 : vector<8x256xf32>
    %cst = arith.constant 2.500000e-01 : f32
    %17 = vector.broadcast %cst : f32 to vector<8x256xf32>
    %18 = arith.mulf %16, %17 : vector<8x256xf32>
    %19 = arith.subf %3, %18 : vector<8x256xf32>
    %20 = arith.subf %5, %18 : vector<8x256xf32>
    %21 = arith.subf %7, %18 : vector<8x256xf32>
    %22 = arith.subf %9, %18 : vector<8x256xf32>
    %23 = arith.mulf %19, %19 : vector<8x256xf32>
    %24 = arith.mulf %20, %20 : vector<8x256xf32>
    %25 = arith.addf %23, %24 : vector<8x256xf32>
    %26 = arith.mulf %21, %21 : vector<8x256xf32>
    %27 = arith.addf %25, %26 : vector<8x256xf32>
    %28 = arith.mulf %22, %22 : vector<8x256xf32>
    %29 = arith.addf %27, %28 : vector<8x256xf32>
    %30 = tpu.concatenate %1, %10, %11, %13, %15, %16, %29 in 0 : vector<8x256xf32>, vector<8x256xf32>, vector<8x256xf32>, vector<8x256xf32>, vector<8x256xf32>, vector<8x256xf32>, vector<8x256xf32> -> vector<56x256xf32>
    %c0_15 = arith.constant 0 : index
    %c0_16 = arith.constant 0 : index
    %31 = vector.load %arg4[%c0_15, %c0_16] : memref<16x56xf32, #tpu.memory_space<vmem>>, vector<16x56xf32>
    %cst_17 = arith.constant dense<0.000000e+00> : vector<16x256xf32>
    %32 = tpu.matmul %31, %30, %cst_17 {dimension_numbers = #tpu.dot_dimension_numbers<[1], [0], [0], [1], [0, 0, 1, 1], [], []>} : vector<16x56xf32>, vector<56x256xf32>, vector<16x256xf32> -> vector<16x256xf32>
    %c0_18 = arith.constant 0 : index
    %c0_19 = arith.constant 0 : index
    %33 = vector.load %arg5[%c0_18, %c0_19] : memref<16x1xf32, #tpu.memory_space<vmem>>, vector<16x1xf32>
    %34 = vector.broadcast %33 : vector<16x1xf32> to vector<16x256xf32>
    %35 = arith.addf %32, %34 : vector<16x256xf32>
    %c0_20 = arith.constant 0 : index
    %c0_21 = arith.constant 0 : index
    %c0_22 = arith.constant 0 : index
    %36 = vector.load %arg6[%c0_20, %c0_21, %c0_22] : memref<1x16x256xf32, #tpu.memory_space<vmem>>, vector<1x16x256xf32>
    %37 = vector.shape_cast %36 : vector<1x16x256xf32> to vector<16x256xf32>
    %38 = vector.shape_cast %35 : vector<16x256xf32> to vector<1x16x256xf32>
    tpu.vector_store %arg6[%c0_20, %c0_21, %c0_22], %38 {strides = array<i32>} : memref<1x16x256xf32, #tpu.memory_space<vmem>>, vector<1x16x256xf32>,
    return
  }
  func.func @transform_0(%arg0: i32, %arg1: i32) -> (i32, i32, i32) {
    %c0_i32 = arith.constant 0 : i32
    %c0_i32_0 = arith.constant 0 : i32
    return %arg0, %c0_i32, %arg1 : i32, i32, i32
  }
  func.func @transform_1(%arg0: i32, %arg1: i32) -> (i32, i32, i32, i32) {
    %c0_i32 = arith.constant 0 : i32
    %c0_i32_0 = arith.constant 0 : i32
    %c0_i32_1 = arith.constant 0 : i32
    return %arg0, %c0_i32, %c0_i32_0, %arg1 : i32, i32, i32, i32
  }
  func.func @transform_2(%arg0: i32, %arg1: i32) -> (i32, i32) {
    %c0_i32 = arith.constant 0 : i32
    %c0_i32_0 = arith.constant 0 : i32
    %c0_i32_1 = arith.constant 0 : i32
    return %c0_i32, %c0_i32_0 : i32, i32
  }
  func.func @transform_3(%arg0: i32, %arg1: i32) -> (i32, i32) {
    %c0_i32 = arith.constant 0 : i32
    %c0_i32_0 = arith.constant 0 : i32
    %c0_i32_1 = arith.constant 0 : i32
    return %c0_i32, %c0_i32_0 : i32, i32
  }
  func.func @transform_4(%arg0: i32, %arg1: i32) -> (i32, i32, i32) {
    %c0_i32 = arith.constant 0 : i32
    %c0_i32_0 = arith.constant 0 : i32
    return %arg0, %c0_i32, %arg1 : i32, i32, i32
  }
}

</mosaic_0001>

<bundles_post_ra>
// kernel: tpu_custom_call.1
= control target key start
LH: loop header
LB: loop body
LE: loop exit
PB: predicated region body
PF: predicated region fallthrough
CT: control target
= control target key end

     0   :  { %9 = vsyncpa [#allocation3], 0  ;;  %s1060_s0 = inlined_call_operand.hbm [shape: f32[2,8,256], index: 0, kind: input, shape index: {}]   ;;  %s1061_s1 = inlined_call_operand.hbm [shape: f32[2,4,8,256], index: 1, kind: input, shape index: {}]   ;;  %s1062_s2 = inlined_call_operand.vmem [shape: f32[16,56], index: 2, kind: input, shape index: {}]   ;;  %s1063_s3 = inlined_call_operand.vmem [shape: f32[16,1], index: 3, kind: input, shape index: {}]   ;;  %s1064_s4 = inlined_call_operand.hbm [shape: f32[2,16,256], index: 4, kind: output, shape index: {}]  }
   0x1   :  { %11 = vsyncpa [#allocation3 + $0x1], 0 }
   0x2   :  { %12 = vsyncpa [#allocation6], 0 }
   0x3   :  { %14 = vsyncpa [#allocation6 + $0x1], 0 }
   0x4   :  { %15 = vsyncpa [#allocation4], 0 }
   0x5   :  { %17 = vsyncpa [#allocation4 + $0x1], 0  ;;  %s855_s15 = smov 0   ;;  %s857_s16 = smov 0  }
   0x6   :  { %s859_s17 = smov 0   ;;  %s861_s18 = smov 0  }
   0x7   :  { %s863_s19 = smov 0   ;;  %s865_s20 = smov 0  }
   0x8 LB: > { %s561_s21 = sadd.s32 4294967295, %s819_s20   ;;  %s562_s22 = sadd.s32 4294967294, %s819_s20   ;;  %s819_s20 = sphi %s865_s20, %s23_s20   ;;  %s815_s19 = sphi %s863_s19, %s1076_s19   ;;  %s811_s18 = sphi %s861_s18, %s1075_s18   ;;  %s807_s17 = sphi %s859_s17, %s1074_s17   ;;  %s803_s16 = sphi %s857_s16, %s1073_s16   ;;  %s799_s15 = sphi %s855_s15, %s1072_s15  }
   0x9   : > { %s35_s23 = sadd.s32 1, %s815_s19  ;;  %s44_s24 = sadd.s32 1, %s807_s17 }
   0xa   : > { %p37_p0 = scmp.ge.s32.totalorder %s35_s23, 2  ;;  %p51_p1 = scmp.ne.s32.totalorder %s807_s17, %s803_s16 }
   0xb   : > { %p52_p2 = scmp.eq.s32.totalorder %s819_s20, 0  ;;  %p57_p3 = scmp.ne.s32.totalorder %s803_s16, %s799_s15 }
   0xc   : > { %s1078_s23 = smov (%p37_p0, %s35_s23), 0  ;;  %p58_p5 = scmp.eq.s32.totalorder %s561_s21, 0 }
   0xd   : > { %p896_p4 = por %p52_p2, %p51_p1  ;;  %s39_s26 = ssub.s32 %s815_s19, %s1078_s23 }
   0xe   : > { %p153_p6 = scmp.eq.s32.totalorder %s561_s21, 1  ;;  %p42_p7 = scmp.eq.s32.totalorder %s39_s26, 0 }
   0xf   : > { %p902_p8 = por %p58_p5, %p57_p3  ;;  %p159_p10 = scmp.eq.s32.totalorder %s562_s22, 1 }
  0x10   : > { %p906_p9 = por %p153_p6, %p51_p1  ;;  %p622_p13 = scmp.lt.s32.totalorder %s819_s20, 2 }
  0x11   : > { %s911_s29 = scalar_select %p42_p7, %s807_s17, %s44_s24  }
  0x12   : > { %p913_p11 = por %p159_p10, %p57_p3  ;;  %s920_s5 = sand.u32 1, %s807_s17  }
  0x13   : > { %s565_s6 = sshll.u32 %s920_s5, 4  ;;  %s588_s7 = sshll.u32 %s815_s19, 8 }
  0x14   : > { %s197_s10 = scalar_lea.hbm %s1060_s0, %s588_s7  ;;  %s189_s11 = scalar_lea.vmem [#allocation2], %s565_s6 }
  0x15   : > { %s199_s12 = sshll.u32 %s189_s11, 4  ;;  %p929_p0 = pnand %p622_p13, %p896_p4  ;;  %s200_s12 = int_to_ptr.vmem [resolvable:$true] %s199_s12 }
  0x16   : > { %p571_p1 = scmp.ge.s32.totalorder %s819_s20, 1  ;;  %p227_p2 = scmp.lt.s32.totalorder %s819_s20, 3 }
  0x17   : > { %s186_s14 = scalar_lea.sflag [#allocation3], %s920_s5  ;;  %p681_p3 = pneg %p929_p0 }
  0x18   : > { %s692_s21 = scalar_lea.vmem %s200_s12, 256  ;;  %s821_s22 = smov [#allocation2]  }
  0x19   : > { %p693_p5 = scmp.ne.s32.totalorder %s200_s12, %s692_s21  ;;  %s697_s24 = sshll.u32 %s821_s22, 4  ;;  %s698_s24 = int_to_ptr.vmem [resolvable:$false] %s697_s24 }
  0x1a   : > { %s699_s25 = scalar_lea.vmem %s698_s24, 512  ;;  %p700_p4 = scmp.lt.s32.totalorder %s200_s12, %s698_s24 }
  0x1b   : > { %p695_p6 = pnand %p693_p5, %p681_p3  ;;  %p701_p10 = scmp.lt.s32.totalorder %s699_s25, %s692_s21 }
  0x1d   : > { %p696_p7 = pneg %p695_p6  ;;  %p702_p13 = por %p701_p10, %p700_p4 }
  0x1f   : > { %p703_p12 = pnand %p702_p13, %p696_p7 }
  0x21   : > { %706 = shalt.err (!%p703_p12)
}
  0x22   : > { %614 = dma.hbm_to_vmem [thread:$0]  (!%p929_p0), %s197_s10, 256, %s200_s12, %s186_s14  }
  0x23   : > { %p947_p5 = pnand %p571_p1, %p227_p2  ;;  %s568_s6 = sshll.u32 %s920_s5, 6 }
  0x24   : > { %s589_s7 = sshll.u32 %s815_s19, 10  ;;  %s210_s21 = scalar_lea.vmem [#allocation5], %s568_s6 }
  0x25   : > { %s218_s11 = scalar_lea.hbm %s1061_s1, %s589_s7  ;;  %s219_s22 = sshll.u32 %s210_s21, 4  ;;  %s220_s22 = int_to_ptr.vmem [resolvable:$true] %s219_s22 }
  0x26   : > { %s207_s24 = scalar_lea.sflag [#allocation6], %s920_s5  ;;  %s720_s25 = scalar_lea.vmem %s220_s22, 1024 }
  0x27   : > { %p721_p12 = scmp.ne.s32.totalorder %s220_s22, %s720_s25  ;;  %s822_s10 = smov [#allocation5]  }
  0x28   : > { %s725_s12 = sshll.u32 %s822_s10, 4  ;;  %s726_s12 = int_to_ptr.vmem [resolvable:$false] %s725_s12 }
  0x29   : > { %p723_p6 = pnand %p721_p12, %p681_p3  ;;  %s727_s14 = scalar_lea.vmem %s726_s12, 2048 }
  0x2a   : > { %p728_p1 = scmp.lt.s32.totalorder %s220_s22, %s726_s12  ;;  %p729_p2 = scmp.lt.s32.totalorder %s727_s14, %s720_s25 }
  0x2b   : > { %p724_p7 = pneg %p723_p6 }
  0x2c   : > { %p730_p4 = por %p729_p2, %p728_p1 }
  0x2e   : > { %p731_p10 = pnand %p730_p4, %p724_p7 }
  0x30   : > { %734 = shalt.err (!%p731_p10)
}
  0x31   : > { %s823_s7 = smov 256   ;;  %s824_s6 = smov 16  }
  0x32   : > { %617 = dma.hbm_to_vmem [thread:$0]  (!%p929_p0), %s218_s11, 1024, %s220_s22, %s207_s24, %s823_s7, %s823_s7, %s824_s6  }
  0x33   : > { %231 = sbr.rel (%p947_p5) target bundleno = 304 (0x130), region = 36  ;;  %s965_s5 = sand.u32 (!%p947_p5), 1, %s803_s16  }
  0x34   : > { %s572_s8 = sshll.u32 (!%p947_p5), %s965_s5, 4  ;;  %s234_s9 = scalar_lea.sflag (!%p947_p5), [#allocation3], %s965_s5 }
  0x35   : > { %s969_s21 = scalar_lea.vmem (!%p947_p5), [#allocation2], %s572_s8 }
  0x38   : > { %786 = dma.done.wait (%p902_p8), %s234_s9, 256  }
  0x39   : > { %788 = vsyncadd (%p902_p8), %s234_s9, 4294967040  ;;  %s573_s13 = sshll.u32 %s965_s5, 6  ;;  %s243_s26 = scalar_lea.sflag [#allocation6], %s965_s5 }
  0x3a   : > { %s246_s11 = scalar_lea.vmem [#allocation5], %s573_s13 }
  0x3b   : > { %790 = dma.done.wait (%p902_p8), %s243_s26, 1024  }
  0x3c   : > { %792 = vsyncadd (%p902_p8), %s243_s26, 4294966272  ;;  %v825_v0 = vmov 0.0   ;;  %v826_v1 = vmov 0   ;;  %v282_v2 = vld [vmem:[%s246_s11 + $0x8] sm:$0xff]  ;;  %v576_v3 = vld [vmem:[%s246_s11 + $0x18] sm:$0xff]  ;;  %vm344_vm0 = vcmask 457728  }
  0x3d   : > { %415 = vmatprep.mubr.f32.mxu0 %v825_v0  ;;  %421 = vmatprep.mubr.f32.mxu1 %v825_v0  ;;  %v578_v4 = vld [vmem:[%s246_s11 + $0x28] sm:$0xff]  ;;  %v580_v5 = vld [vmem:[%s246_s11 + $0x38] sm:$0xff]  ;;  %v281_v7 = vld [vmem:[%s246_s11] sm:$0xff]  ;;  %s574_s6 = sshll.u32 %s965_s5, 5  ;;  %s827_s22 = smov [#allocation7]  }
  0x3e   : > { %678 = vset.pattern.permute.xlu0 %v826_v1  ;;  %v981_v6 = vadd.f32 %v578_v4, %v282_v2  ;;  %v575_v8 = vld [vmem:[%s246_s11 + $0x10] sm:$0xff]  ;;  %v295_v9 = vadd.f32 %v580_v5, %v576_v3  ;;  %v577_v10 = vld [vmem:[%s246_s11 + $0x20] sm:$0xff]  ;;  %v333_v18 = vld [vmem:[%s1063_s3 + $0x8] sm:$0xff]  ;;  %v301_v39 = vsub.f32 %v576_v3, %v580_v5  ;;  %v297_v43 = vsub.f32 %v282_v2, %v578_v4  ;;  %s275_s8 = scalar_lea.vmem [#allocation7], %s574_s6  ;;  %s739_s24 = sshll.u32 %s827_s22, 4  ;;  %s740_s24 = int_to_ptr.vmem [resolvable:$false] %s739_s24 }
  0x3f   : > { %v579_v11 = vld [vmem:[%s246_s11 + $0x30] sm:$0xff]  ;;  %v983_v12 = vadd.f32 %v577_v10, %v281_v7  ;;  %v332_v15 = vld [vmem:[%s1063_s3] sm:$0xff]  ;;  %v296_v45 = vsub.f32 %v281_v7, %v577_v10  ;;  %v280_v50 = vld [vmem:[%s969_s21 + $0x8] sm:$0xff]  ;;  %s448_s9 = sshll.u32 %s275_s8, 4  ;;  %s741_s25 = scalar_lea.vmem %s740_s24, 1024  ;;  %s1007_s9 = int_to_ptr.vmem [resolvable:$true] %s448_s9 }
  0x40   : > { %v294_v13 = vadd.f32 %v579_v11, %v575_v8  ;;  %v305_v14 = vadd.f32 %v295_v9, %v981_v6  ;;  %336 = vperm.xlu0 %678, %v332_v15   ;;  %v300_v41 = vsub.f32 %v575_v8, %v579_v11  ;;  %v303_v46 = vand.u32 2147483647, %v301_v39  ;;  %v279_v51 = vld [vmem:[%s969_s21] sm:$0xff]  ;;  %v331_v53 = vld [vmem:[%s1062_s2 + $0x8] sm:$0xff]  ;;  %s590_s21 = sshll.u32 %s811_s18, 9  ;;  %s433_s18 = scalar_lea.sflag [#allocation4], %s965_s5 }
  0x41   : > { %v299_v48 = vand.u32 2147483647, %v297_v43  ;;  %v298_v49 = vand.u32 2147483647, %v296_v45  ;;  %v330_v52 = vld [vmem:[%s1062_s2] sm:$0xff]  ;;  %s1012_s11 = scalar_lea.hbm %s1064_s4, %s590_s21  ;;  %s735_s27 = scalar_lea.vmem %s1007_s9, 512 }
  0x42   : > { %v304_v16 = vadd.f32 %v294_v13, %v983_v12  ;;  %v307_v17 = vmul.f32 0.25, %v305_v14  ;;  %v302_v47 = vand.u32 2147483647, %v300_v41  ;;  %p736_p8 = scmp.ne.s32.totalorder %s1007_s9, %s735_s27  ;;  %p742_p13 = scmp.lt.s32.totalorder %s1007_s9, %s740_s24 }
  0x43   : > { %p743_p5 = scmp.lt.s32.totalorder %s741_s25, %s735_s27 }
  0x44   : > { %v306_v19 = vmul.f32 0.25, %v304_v16  ;;  %v309_v20 = vsub.f32 %v282_v2, %v307_v17  ;;  %v311_v21 = vsub.f32 %v576_v3, %v307_v17  ;;  %v313_v22 = vsub.f32 %v578_v4, %v307_v17  ;;  %341 = vperm.xlu0 %678, %v333_v18   ;;  %p737_p0 = pnand %p736_p8, %p906_p9 }
  0x45   : > { %v315_v23 = vsub.f32 %v580_v5, %v307_v17  ;;  %p744_p12 = por %p743_p5, %p742_p13 }
  0x46   : > { %v308_v24 = vsub.f32 %v281_v7, %v306_v19  ;;  %v310_v25 = vsub.f32 %v575_v8, %v306_v19  ;;  %v312_v26 = vsub.f32 %v577_v10, %v306_v19  ;;  %v314_v27 = vsub.f32 %v579_v11, %v306_v19  ;;  %p738_p3 = pneg %p737_p0 }
  0x47   : > { %v317_v28 = vmul.f32 %v309_v20, %v309_v20  ;;  %v319_v29 = vmul.f32 %v311_v21, %v311_v21  ;;  %v323_v30 = vmul.f32 %v313_v22, %v313_v22  ;;  %v327_v35 = vmul.f32 %v315_v23, %v315_v23 }
  0x48   : > { %v316_v31 = vmul.f32 %v308_v24, %v308_v24  ;;  %v318_v32 = vmul.f32 %v310_v25, %v310_v25  ;;  %v322_v33 = vmul.f32 %v312_v26, %v312_v26  ;;  %v326_v37 = vmul.f32 %v314_v27, %v314_v27  ;;  %p745_p6 = pnand %p744_p12, %p738_p3 }
  0x49   : > { %v321_v34 = vadd.f32 %v319_v29, %v317_v28 }
  0x4a   : > { %v320_v36 = vadd.f32 %v318_v32, %v316_v31 }
  0x4b   : > { %v325_v38 = vadd.f32 %v323_v30, %v321_v34 }
  0x4c   : > { %v324_v40 = vadd.f32 %v322_v33, %v320_v36 }
  0x4d   : > { %v329_v42 = vadd.f32 %v327_v35, %v325_v38 }
  0x4e   : > { %v328_v44 = vadd.f32 %v326_v37, %v324_v40 }
  0x4f   : > { %369 = vmatprep.subr.mxu0 %v329_v42  ;;  %591 = vmatprep.subr.mxu1 %v329_v42 }
  0x50   : > { %370 = vmatpush1.msra.mxu0 %v328_v44  ;;  %598 = vmatpush1.msra.mxu1 %v328_v44 }
  0x51   : > { %371 = vmatprep.subr.mxu0 %v305_v14  ;;  %592 = vmatprep.subr.mxu1 %v305_v14 }
  0x52   : > { %372 = vmatpush1.msra.mxu0 %v304_v16  ;;  %599 = vmatpush1.msra.mxu1 %v304_v16 }
  0x53   : > { %373 = vmatprep.subr.mxu0 %v303_v46  ;;  %593 = vmatprep.subr.mxu1 %v303_v46 }
  0x54   : > { %374 = vmatpush1.msra.mxu0 %v302_v47  ;;  %600 = vmatpush1.msra.mxu1 %v302_v47 }
  0x55   : > { %375 = vmatprep.subr.mxu0 %v299_v48  ;;  %594 = vmatprep.subr.mxu1 %v299_v48 }
  0x56   : > { %376 = vmatpush1.msra.mxu0 %v298_v49  ;;  %601 = vmatpush1.msra.mxu1 %v298_v49 }
  0x57   : > { %377 = vmatprep.subr.mxu0 %v295_v9  ;;  %595 = vmatprep.subr.mxu1 %v295_v9 }
  0x58   : > { %378 = vmatpush1.msra.mxu0 %v294_v13  ;;  %602 = vmatpush1.msra.mxu1 %v294_v13 }
  0x59   : > { %379 = vmatprep.subr.mxu0 %v981_v6  ;;  %596 = vmatprep.subr.mxu1 %v981_v6 }
  0x5a   : > { %380 = vmatpush1.msra.mxu0 %v983_v12  ;;  %603 = vmatpush1.msra.mxu1 %v983_v12 }
  0x5b   : > { %381 = vmatprep.subr.mxu0 %v280_v50  ;;  %597 = vmatprep.subr.mxu1 %v280_v50 }
  0x5c   : > { %382 = vmatpush1.msra.mxu0 %v279_v51  ;;  %604 = vmatpush1.msra.mxu1 %v279_v51 }
  0x5d   : > { %581 = vmatmul.mubr.msk.f32.vlgmr.msra.gmra.mxu0 %vm344_vm0, %v330_v52  ;;  %582 = vmatmul.mubr.msk.f32.vlgmr.msra.gmra.mxu1 %vm344_vm0, %v331_v53 }
  0xbb   : > { %v337_v54 = vpop.permute.xlu0 %336 }
  0xbf   : > { %v342_v55 = vpop.permute.xlu0 %341 }
 0x11d   : > { %v417_v56 = vpop.f32.mrf.mxu0  ;;  %v423_v57 = vpop.f32.mrf.mxu1 }
 0x11e   : > { %v418_v58 = vadd.f32 %v417_v56, %v337_v54  ;;  %v424_v59 = vadd.f32 %v423_v57, %v342_v55 }
 0x11f   : > { %v419_v60 = vpop.f32.mrf.mxu0  ;;  %v425_v61 = vpop.f32.mrf.mxu1 }
 0x120   : > { %428 = vst [vmem:[%s275_s8] sm:$0xff] %v418_v58  ;;  %430 = vst [vmem:[%s275_s8 + $0x10] sm:$0xff] %v424_v59  ;;  %v420_v62 = vadd.f32 %v419_v60, %v337_v54  ;;  %v426_v63 = vadd.f32 %v425_v61, %v342_v55 }
 0x122   : > { %429 = vst [vmem:[%s275_s8 + $0x8] sm:$0xff] %v420_v62  ;;  %431 = vst [vmem:[%s275_s8 + $0x18] sm:$0xff] %v426_v63 }
 0x123   : > { %748 = shalt.err (!%p745_p6)
}
 0x124   : > { %s749_s10 = scalar_lea.hbm %s1012_s11, 512  ;;  %s753_s7 = scalar_lea.hbm %s1064_s4, 1024 }
 0x125   : > { %p750_p7 = scmp.ne.s32.totalorder %s1012_s11, %s749_s10  ;;  %p754_p4 = scmp.lt.s32.totalorder %s1012_s11, %s1064_s4 }
 0x126   : > { %p755_p10 = scmp.lt.s32.totalorder %s753_s7, %s749_s10 }
 0x127   : > { %p751_p1 = pnand %p750_p7, %p906_p9 }
 0x128   : > { %p756_p8 = por %p755_p10, %p754_p4 }
 0x129   : > { %p752_p2 = pneg %p751_p1 }
 0x12b   : > { %p757_p0 = pnand %p756_p8, %p752_p2 }
 0x12d   : > { %760 = shalt.err (!%p757_p0)
}
 0x12e   : > { %s828_s21 = smov 256   ;;  %s829_s13 = smov 16  }
 0x12f   : > { %609 = dma.vmem_to_hbm [thread:$0]  (%p906_p9), %s1007_s9, 512, %s1012_s11, %s433_s18, %s828_s21, %s828_s21, %s829_s13  }
 0x130 PF: > { %s463_s26 = sand.u32 1, %s799_s15   ;;  %p1071_p3 = scmp.ge.s32.totalorder %s819_s20, 2 }
 0x131   : > { %s464_s27 = scalar_lea.sflag [#allocation4], %s463_s26 }
 0x132   : > { %p619_p13 = pnand %p1071_p3, %p913_p11 }
 0x134   : > { %p620_p5 = pneg %p619_p13 }
 0x136   : > { %794 = dma.done.wait (%p620_p5), %s464_s27, 512  }
 0x137   : > { %796 = vsyncadd (%p620_p5), %s464_s27, 4294966784  ;;  %s23_s20 = sadd.s32 1, %s819_s20   ;;  %s1072_s15 = smov %s803_s16 }
 0x138   : > { %p20_p12 = scmp.ge.s32.totalorder %s23_s20, 4   ;;  %s1073_s16 = smov %s807_s17 }
 0x139   : > { %s1074_s17 = smov %s911_s29  ;;  %s1075_s18 = smov %s815_s19 }
 0x13a   : > { %s1076_s19 = smov %s1078_s23  ;;  %22 = sbr.rel (!%p20_p12) target bundleno = 8 (0x8), region = 97 }
 0x13f   :  { %469 = vsyncpa [#allocation3], 1 }
 0x140   :  { %471 = vsyncpa [#allocation3 + $0x1], 1 }
 0x141   :  { %472 = vsyncpa [#allocation6], 1 }
 0x142   :  { %474 = vsyncpa [#allocation6 + $0x1], 1 }
 0x143   :  { %475 = vsyncpa [#allocation4], 1 }
 0x144   :  { %477 = vsyncpa [#allocation4 + $0x1], 1 }

</bundles_post_ra>
